<compile_context>
chip_gen: v5e
topology: v5e:2x2
jax: 0.10.0
libtpu: 0.0.40
codegen_flags: <defaults>
</compile_context>

<pallas_src>
import jax
import jax.numpy as jnp
from jax import lax
from jax.experimental import pallas as pl
from jax.experimental.pallas import tpu as pltpu


def _dynamics_back_kernel(x_ref, w_ref, o_ref):
    # y = x @ w.T : contract the shared feature dim (last dim of both operands),
    # f32 accumulation on the MXU. x_ref: (tm, b), w_ref: (b_pad, b) -> (tm, b_pad).
    y = lax.dot_general(
        x_ref[...],
        w_ref[...],
        dimension_numbers=(((1,), (1,)), ((), ())),
        preferred_element_type=jnp.float32,
    )
    o_ref[...] = y.astype(o_ref.dtype)


def _round_up(v, m):
    return ((v + m - 1) // m) * m


def dynamics_back_forward(x, w_back, *, tile_m=512):
    """Apply the backward-dynamics linear map with a Pallas kernel.

    x:      [N, b]  activations
    w_back: [b, b]  PyTorch-style Linear weight (out_features, in_features)
    returns [N, b] = x @ w_back.T
    """
    n, b = x.shape
    b_out, b_in = w_back.shape
    assert b_in == b and b_out == b, "dynamics_back weight must be (b, b)"

    # Lane-dense output: pad out-feature dim up to a multiple of 128 (zeros).
    b_pad = max(128, _round_up(b_out, 128))
    w = w_back if b_pad == b_out else jnp.pad(w_back, ((0, b_pad - b_out), (0, 0)))

    out_dtype = x.dtype
    itemsize = jnp.dtype(out_dtype).itemsize
    cost = pl.CostEstimate(
        flops=2 * n * b_pad * b,
        transcendentals=0,
        bytes_accessed=(n * b + b_pad * b + n * b_pad) * itemsize,
    )

    if n <= tile_m:
        # Latency path: single VMEM-resident tile, no grid machinery.
        y = pl.pallas_call(
            _dynamics_back_kernel,
            out_shape=jax.ShapeDtypeStruct((n, b_pad), out_dtype),
            in_specs=[
                pl.BlockSpec(memory_space=pltpu.MemorySpace.VMEM),
                pl.BlockSpec(memory_space=pltpu.MemorySpace.VMEM),
            ],
            out_specs=pl.BlockSpec(memory_space=pltpu.MemorySpace.VMEM),
            cost_estimate=cost,
        )(x, w)
    else:
        # Throughput path: tile rows, keep weight resident, parallel over N.
        n_tiles = pl.cdiv(n, tile_m)
        n_pad = n_tiles * tile_m
        x_p = x if n_pad == n else jnp.pad(x, ((0, n_pad - n), (0, 0)))
        y = pl.pallas_call(
            _dynamics_back_kernel,
            out_shape=jax.ShapeDtypeStruct((n_pad, b_pad), out_dtype),
            grid=(n_tiles,),
            in_specs=[
                pl.BlockSpec((tile_m, b), lambda i: (i, 0)),
                pl.BlockSpec((b_pad, b), lambda i: (0, 0)),  # resident weight
            ],
            out_specs=pl.BlockSpec((tile_m, b_pad), lambda i: (i, 0)),
            compiler_params=pltpu.CompilerParams(
                dimension_semantics=("parallel",),
            ),
            cost_estimate=cost,
        )(x_p, w)
        y = y[:n]

    return y[:, :b_out]


if __name__ == "__main__":
    key = jax.random.PRNGKey(0)
    k_omega, k_x1, k_x2 = jax.random.split(key, 3)

    b = 32      # latent/Koopman dimension of the dynamics operator
    batch = 8   # number of latent states to propagate backward

    # Deterministic synthetic "omega" forward-dynamics weight (as nn.Linear(b, b)
    # would hold), then build the backward operator exactly as the module does:
    #   W_back = pinverse(W_omega.T)
    # TODO(synk): pinverse is one-time weight construction (module __init__), done
    # in plain JAX rather than inside the Pallas kernel.
    w_omega = jax.random.normal(k_omega, (b, b), dtype=jnp.float32)
    w_back = jnp.linalg.pinv(w_omega.T)

    # --- small-batch (gridless latency) path ---
    x = jax.random.normal(k_x1, (batch, b), dtype=jnp.float32)
    y = jax.block_until_ready(dynamics_back_forward(x, w_back))
    y_ref = x @ w_back.T
    assert y.shape == (batch, b)
    assert jnp.allclose(y, y_ref, atol=1e-4, rtol=1e-4), "small-path mismatch"

    # --- tiled (grid over N, row-padded) path, exercised with a small tile ---
    batch2 = 200
    x2 = jax.random.normal(k_x2, (batch2, b), dtype=jnp.float32)
    y2 = jax.block_until_ready(dynamics_back_forward(x2, w_back, tile_m=64))
    y2_ref = x2 @ w_back.T
    assert y2.shape == (batch2, b)
    assert jnp.allclose(y2, y2_ref, atol=1e-4, rtol=1e-4), "tiled-path mismatch"

    print("KERNEL_OK")
</pallas_src>

<mosaic_0001>
module attributes {stable_mosaic.version = 11 : i64} {
  func.func @_dynamics_back_kernel(%arg0: memref<8x32xf32, #tpu.memory_space<vmem>>, %arg1: memref<128x32xf32, #tpu.memory_space<vmem>>, %arg2: memref<8x128xf32, #tpu.memory_space<vmem>>) attributes {dimension_semantics = [], scalar_prefetch = 0 : i64, scratch_operands = 0 : i64, tpu.core_type = #tpu.core_type<tc>} {
    %c0 = arith.constant 0 : index
    %c0_0 = arith.constant 0 : index
    %0 = vector.load %arg0[%c0, %c0_0] : memref<8x32xf32, #tpu.memory_space<vmem>>, vector<8x32xf32>
    %c0_1 = arith.constant 0 : index
    %c0_2 = arith.constant 0 : index
    %1 = vector.load %arg1[%c0_1, %c0_2] : memref<128x32xf32, #tpu.memory_space<vmem>>, vector<128x32xf32>
    %cst = arith.constant dense<0.000000e+00> : vector<8x128xf32>
    %2 = tpu.matmul %0, %1, %cst {dimension_numbers = #tpu.dot_dimension_numbers<[1], [1], [0], [0], [0, 0, 1, 0], [], []>} : vector<8x32xf32>, vector<128x32xf32>, vector<8x128xf32> -> vector<8x128xf32>
    %c0_3 = arith.constant 0 : index
    %c0_4 = arith.constant 0 : index
    %3 = vector.load %arg2[%c0_3, %c0_4] : memref<8x128xf32, #tpu.memory_space<vmem>>, vector<8x128xf32>
    tpu.vector_store %arg2[%c0_3, %c0_4], %2 {strides = array<i32>} : memref<8x128xf32, #tpu.memory_space<vmem>>, vector<8x128xf32>,
    return
  }
}

</mosaic_0001>

<bundles_post_ra>
// kernel: tpu_custom_call.1
= control target key start
LH: loop header
LB: loop body
LE: loop exit
PB: predicated region body
PF: predicated region fallthrough
CT: control target
= control target key end

     0   :  { %vm29_vm0 = vcmask 261120   ;;  %s249_s0 = inlined_call_operand.vmem [shape: f32[8,32], index: 0, kind: input, shape index: {}]   ;;  %s250_s1 = inlined_call_operand.vmem [shape: f32[128,32], index: 1, kind: input, shape index: {}]   ;;  %s251_s2 = inlined_call_operand.hbm [shape: f32[8,128], index: 2, kind: output, shape index: {}]  }
   0x1   :  { %v28_v0 = vld [vmem:[%s250_s1 + $0x78] sm:$0xff]  ;;  %v27_v1 = vld [vmem:[%s250_s1 + $0x70] sm:$0xff] }
   0x2   :  { %118 = vmatpush.xpose.msk.msra.mxu0 %vm29_vm0, %v28_v0 }
   0x3   :  { %7 = vsyncpa [#allocation3], 0  ;;  %v26_v2 = vld [vmem:[%s250_s1 + $0x68] sm:$0xff]  ;;  %v25_v3 = vld [vmem:[%s250_s1 + $0x60] sm:$0xff]  ;;  %s162_s15 = smov [#allocation2]   ;;  %s109_s19 = sshll.u32 %s251_s2, 4  ;;  %s110_s19 = int_to_ptr.hbm [resolvable:$true] %s109_s19 }
   0x4   :  { %v24_v4 = vld [vmem:[%s250_s1 + $0x58] sm:$0xff]  ;;  %v23_v5 = vld [vmem:[%s250_s1 + $0x50] sm:$0xff]  ;;  %v22_v6 = vld [vmem:[%s250_s1 + $0x48] sm:$0xff]  ;;  %s107_s16 = sshll.u32 %s162_s15, 4  ;;  %s108_s16 = int_to_ptr.vmem [resolvable:$true] %s107_s16 }
   0x5   :  { %v21_v7 = vld [vmem:[%s250_s1 + $0x40] sm:$0xff]  ;;  %v20_v8 = vld [vmem:[%s250_s1 + $0x38] sm:$0xff]  ;;  %v19_v9 = vld [vmem:[%s250_s1 + $0x30] sm:$0xff] }
   0x6   :  { %119 = vmatpush.xpose.msk.msra.mxu0 %vm29_vm0, %v27_v1  ;;  %v18_v10 = vld [vmem:[%s250_s1 + $0x28] sm:$0xff]  ;;  %v17_v11 = vld [vmem:[%s250_s1 + $0x20] sm:$0xff]  ;;  %v16_v12 = vld [vmem:[%s250_s1 + $0x18] sm:$0xff] }
   0x7   :  { %v15_v13 = vld [vmem:[%s250_s1 + $0x10] sm:$0xff]  ;;  %v14_v14 = vld [vmem:[%s250_s1 + $0x8] sm:$0xff]  ;;  %v13_v15 = vld [vmem:[%s250_s1] sm:$0xff] }
   0x8   :  { %v12_v16 = vld [vmem:[%s249_s0] sm:$0xff] }
   0xa   :  { %120 = vmatpush.xpose.msk.msra.mxu0 %vm29_vm0, %v26_v2 }
   0xe   :  { %121 = vmatpush.xpose.msk.msra.mxu0 %vm29_vm0, %v25_v3 }
  0x12   :  { %122 = vmatpush.xpose.msk.msra.mxu0 %vm29_vm0, %v24_v4 }
  0x16   :  { %123 = vmatpush.xpose.msk.msra.mxu0 %vm29_vm0, %v23_v5 }
  0x1a   :  { %124 = vmatpush.xpose.msk.msra.mxu0 %vm29_vm0, %v22_v6 }
  0x1e   :  { %125 = vmatpush.xpose.msk.msra.mxu0 %vm29_vm0, %v21_v7 }
  0x22   :  { %126 = vmatpush.xpose.msk.msra.mxu0 %vm29_vm0, %v20_v8 }
  0x26   :  { %127 = vmatpush.xpose.msk.msra.mxu0 %vm29_vm0, %v19_v9 }
  0x2a   :  { %128 = vmatpush.xpose.msk.msra.mxu0 %vm29_vm0, %v18_v10 }
  0x2e   :  { %129 = vmatpush.xpose.msk.msra.mxu0 %vm29_vm0, %v17_v11 }
  0x32   :  { %130 = vmatpush.xpose.msk.msra.mxu0 %vm29_vm0, %v16_v12 }
  0x36   :  { %131 = vmatpush.xpose.msk.msra.mxu0 %vm29_vm0, %v15_v13 }
  0x3a   :  { %132 = vmatpush.xpose.msk.msra.mxu0 %vm29_vm0, %v14_v14 }
  0x3e   :  { %133 = vmatpush.xpose.msk.msra.mxu0 %vm29_vm0, %v13_v15 }
  0x41   :  { %134 = vmatmul.msk.f32.vlgmr.msra.gmra.mxu0 %vm29_vm0, %v12_v16 }
  0xbe   :  { %v98_v17 = vpop.f32.mrf.mxu0 }
  0xbf   :  { %101 = vst [vmem:[#allocation2] sm:$0xff] %v98_v17 }
  0xc0   :  { %112 = dma.vmem_to_hbm [thread:$0]  %s108_s16, 128, %s110_s19, [#allocation3]  }
  0xc1   :  { %160 = dma.done.wait [#allocation3], 128  }
  0xc2   :  { %161 = vsyncadd [#allocation3], 4294967168 }
  0xc3   :  { %117 = vsyncpa [#allocation3], 1 }

</bundles_post_ra>
